<compile_context>
chip_gen: v7x
topology: tpu7x:2x2x1
jax: 0.10.0
libtpu: 0.0.40
codegen_flags: <defaults>
</compile_context>

<pallas_src>
import jax
import jax.numpy as jnp
from jax.experimental import pallas as pl
from jax.experimental.pallas import tpu as pltpu


def _diff_thresh_kernel(scale_ref, img_ref, th_ref, out_ref):
    # scale_ref: (1, 1) SMEM scalar holding alpha / (img_max - img_min)
    scale = scale_ref[0, 0]
    out_ref[...] = (img_ref[...] - th_ref[...]) * scale


def _round_up(x, m):
    return ((x + m - 1) // m) * m


def _choose_lanes(total):
    for lanes in (1024, 512, 256, 128):
        if total % lanes == 0:
            return lanes
    return None


def _choose_tm(rows):
    if rows <= 8:
        return rows                      # single block == full sublane extent
    # Keep ~8+ row-blocks so the "parallel" axis can be split across v7x's two
    # TensorCores; cap at 1024 rows (4 MiB/operand tile @ LANES=1024).
    tm = _round_up(max(rows // 8, 1), 8)
    return max(8, min(1024, tm))


def _diff_thresh_2d(img2d, th2d, scale):
    rows, lanes = img2d.shape
    tm = _choose_tm(rows)
    num_blocks = -(-rows // tm)          # Pallas masks the partial last block
    tile_bytes = tm * lanes * 4

    # Small tiles on fast-HBM parts (v7x) expose DMA issue/turnaround latency:
    # give the two inputs a third buffer when tiles are small and the grid is
    # deep enough to benefit.
    use_buffered = tile_bytes < 2 * 1024 * 1024 and num_blocks >= 4
    if use_buffered:
        in_tile_spec = pl.BlockSpec((tm, lanes), lambda i: (i, 0),
                                    pipeline_mode=pl.Buffered(3))
    else:
        in_tile_spec = pl.BlockSpec((tm, lanes), lambda i: (i, 0))

    n_in_bufs = 3 if use_buffered else 2
    vmem_limit = max(32 * 1024 * 1024,
                     (2 * n_in_bufs + 2) * tile_bytes + 16 * 1024 * 1024)

    n_elems = rows * lanes
    cost = pl.CostEstimate(flops=2 * n_elems, transcendentals=0,
                           bytes_accessed=12 * n_elems)

    return pl.pallas_call(
        _diff_thresh_kernel,
        out_shape=jax.ShapeDtypeStruct((rows, lanes), img2d.dtype),
        grid_spec=pltpu.PrefetchScalarGridSpec(
            num_scalar_prefetch=0,
            grid=(num_blocks,),
            in_specs=[
                pl.BlockSpec(memory_space=pltpu.SMEM),   # folded scale scalar
                in_tile_spec,                            # img tile
                in_tile_spec,                            # th tile
            ],
            out_specs=pl.BlockSpec((tm, lanes), lambda i: (i, 0)),
        ),
        compiler_params=pltpu.CompilerParams(
            dimension_semantics=("parallel",),   # independent tiles -> megacore
            vmem_limit_bytes=vmem_limit,
        ),
        cost_estimate=cost,
        # NOTE: input_output_aliases={1: 0} would write in place when the
        # caller donates `img`; skipped (footprint-only win, no BW change).
    )(scale, img2d, th2d)


def difference_thresh(img, th, alpha, img_min=0.0, img_max=1.0):
    """Pallas implementation of DifferenceThresh.forward.

    img, th: NCHW float32 arrays of identical shape.
    alpha:   scalar (or (1,1,1,1)) float32 parameter.
    """
    assert img.shape == th.shape
    orig_shape = img.shape
    total = 1
    for d in orig_shape:
        total *= d

    # Fold the constant divide into one scalar.
    # NOTE: changes rounding order vs (x*alpha)/(max-min); ~1 ulp at f32,
    # flag if bit-exact parity with PyTorch is required.
    scale_scalar = (jnp.asarray(alpha, jnp.float32).reshape(()) /
                    jnp.float32(img_max - img_min))
    scale = scale_scalar.reshape(1, 1)

    lanes = _choose_lanes(total)
    if lanes is not None:
        # Fast path: lane-dense reshape is a free bitcast, no pad copies.
        out2d = _diff_thresh_2d(img.reshape(total // lanes, lanes),
                                th.reshape(total // lanes, lanes),
                                scale)
        return out2d.reshape(orig_shape)

    # Ragged path (element count not a multiple of 128): kernel on the
    # 128-aligned prefix, plain-jnp tail (< 128 elements).  Avoids full-tensor
    # pad copies; the concat only touches the output once.
    aligned = (total // 128) * 128
    if aligned == 0:
        return ((img - th) * scale_scalar).astype(img.dtype)
    img_flat = img.reshape(-1)
    th_flat = th.reshape(-1)
    lanes = _choose_lanes(aligned)
    out_head = _diff_thresh_2d(
        img_flat[:aligned].reshape(aligned // lanes, lanes),
        th_flat[:aligned].reshape(aligned // lanes, lanes),
        scale).reshape(-1)
    out_tail = ((img_flat[aligned:] - th_flat[aligned:]) *
                scale_scalar).astype(img.dtype)
    return jnp.concatenate([out_head, out_tail]).reshape(orig_shape)


if __name__ == "__main__":
    # Deterministic parameter init (matches nn.Parameter full of init_alpha).
    img_min, img_max, init_alpha = 0.0, 1.0, 16.0
    alpha = jnp.full((1, 1, 1, 1), init_alpha, dtype=jnp.float32)

    key = jax.random.PRNGKey(0)
    k_img, k_th = jax.random.split(key)
    shape = (2, 4, 16, 16)  # NCHW
    img = jax.random.uniform(k_img, shape, dtype=jnp.float32)
    th = jax.random.uniform(k_th, shape, dtype=jnp.float32)

    out = difference_thresh(img, th, alpha, img_min=img_min, img_max=img_max)
    out = jax.block_until_ready(out)

    # Reference check against plain-JAX forward.
    ref = (img - th) * alpha / (img_max - img_min)
    assert out.shape == shape and out.dtype == jnp.float32
    assert jnp.allclose(out, ref, rtol=1e-6, atol=1e-6)

    print("KERNEL_OK")
</pallas_src>

<mosaic_0001>
module attributes {stable_mosaic.version = 11 : i64} {
  func.func @_diff_thresh_kernel(%arg0: i32, %arg1: memref<1x1xf32, #tpu.memory_space<smem>>, %arg2: memref<2x1024xf32, #tpu.memory_space<vmem>>, %arg3: memref<2x1024xf32, #tpu.memory_space<vmem>>, %arg4: memref<2x1024xf32, #tpu.memory_space<vmem>>) attributes {dimension_semantics = [#tpu.dimension_semantics<parallel>], iteration_bounds = array<i64: 1>, scalar_prefetch = 0 : i64, scratch_operands = 0 : i64, tpu.core_type = #tpu.core_type<tc>, window_params = [{transform_indices = @transform_0, window_bounds = array<i64: 1, 1>}, {transform_indices = @transform_1, window_bounds = array<i64: 2, 1024>}, {transform_indices = @transform_2, window_bounds = array<i64: 2, 1024>}, {transform_indices = @transform_3, window_bounds = array<i64: 2, 1024>}]} {
    %c0 = arith.constant 0 : index
    %c0_0 = arith.constant 0 : index
    %0 = memref.load %arg1[%c0, %c0_0] : memref<1x1xf32, #tpu.memory_space<smem>>
    %c0_1 = arith.constant 0 : index
    %c0_2 = arith.constant 0 : index
    %1 = vector.load %arg2[%c0_1, %c0_2] : memref<2x1024xf32, #tpu.memory_space<vmem>>, vector<2x1024xf32>
    %c0_3 = arith.constant 0 : index
    %c0_4 = arith.constant 0 : index
    %2 = vector.load %arg3[%c0_3, %c0_4] : memref<2x1024xf32, #tpu.memory_space<vmem>>, vector<2x1024xf32>
    %3 = arith.subf %1, %2 : vector<2x1024xf32>
    %4 = vector.broadcast %0 : f32 to vector<2x1024xf32>
    %5 = arith.mulf %3, %4 : vector<2x1024xf32>
    %c0_5 = arith.constant 0 : index
    %c0_6 = arith.constant 0 : index
    %6 = vector.load %arg4[%c0_5, %c0_6] : memref<2x1024xf32, #tpu.memory_space<vmem>>, vector<2x1024xf32>
    tpu.vector_store %arg4[%c0_5, %c0_6], %5 {strides = array<i32>} : memref<2x1024xf32, #tpu.memory_space<vmem>>, vector<2x1024xf32>,
    return
  }
  func.func @transform_0(%arg0: i32) -> (i32, i32) {
    %c0_i32 = arith.constant 0 : i32
    %c0_i32_0 = arith.constant 0 : i32
    %c0_i32_1 = arith.constant 0 : i32
    return %c0_i32, %c0_i32_0 : i32, i32
  }
  func.func @transform_1(%arg0: i32) -> (i32, i32) {
    %c0_i32 = arith.constant 0 : i32
    %c0_i32_0 = arith.constant 0 : i32
    return %arg0, %c0_i32 : i32, i32
  }
  func.func @transform_2(%arg0: i32) -> (i32, i32) {
    %c0_i32 = arith.constant 0 : i32
    %c0_i32_0 = arith.constant 0 : i32
    return %arg0, %c0_i32 : i32, i32
  }
  func.func @transform_3(%arg0: i32) -> (i32, i32) {
    %c0_i32 = arith.constant 0 : i32
    %c0_i32_0 = arith.constant 0 : i32
    return %arg0, %c0_i32 : i32, i32
  }
}

</mosaic_0001>

<bundles_post_ra>
// kernel: tpu_custom_call.1
= control target key start
LH: loop header
LB: loop body
LE: loop exit
PB: predicated region body
PF: predicated region fallthrough
CT: control target
= control target key end

     0   :  { %9 = vsyncpa [#allocation4], 0  ;;  %s205_s0 = inlined_call_operand.<no memory space> [shape: f32[1,1], index: 0, kind: input, shape index: {}]   ;;  %s206_s1 = inlined_call_operand.hbm [shape: f32[2,1024], index: 1, kind: input, shape index: {}]   ;;  %s207_s2 = inlined_call_operand.hbm [shape: f32[2,1024], index: 2, kind: input, shape index: {}]   ;;  %s208_s3 = inlined_call_operand.hbm [shape: f32[2,1024], index: 3, kind: output, shape index: {}]  }
   0x1   :  { %10 = vsyncpa [#allocation7], 0 }
   0x2   :  { %11 = vsyncpa [#allocation5], 0  ;;  %s143_s12 = smov [#allocation3]   ;;  %s144_s14 = smov [#allocation6]  }
   0x3   :  { %s20_s13 = sshll.u32 %s143_s12, 4  ;;  %s30_s15 = sshll.u32 %s144_s14, 4  ;;  %s21_s13 = int_to_ptr.vmem [resolvable:$true] %s20_s13  ;;  %s31_s15 = int_to_ptr.vmem [resolvable:$true] %s30_s15 }
   0x4   :  { %s71_s18 = scalar_lea.hbm %s206_s1, 256 }
   0x5   :  { %p72_p0 = scmp.ne.s32.totalorder %s206_s1, %s71_s18  ;;  %p75_p1 = scmp.lt.u32.totalorder %s71_s18, %s206_s1 }
   0x7   :  { %p77_p2 = pnand %p75_p1, %p72_p0 }
   0x9   :  { %80 = shalt.err (!%p77_p2)
}
   0xa   :  { %s81_s23 = scalar_lea.vmem %s21_s13, 256  ;;  %p86_p4 = scmp.lt.s32.totalorder %s21_s13, %s21_s13 }
   0xb   :  { %p82_p3 = scmp.ne.s32.totalorder %s21_s13, %s81_s23  ;;  %p87_p5 = scmp.lt.s32.totalorder %s81_s23, %s81_s23 }
   0xd   :  { %p88_p6 = por %p87_p5, %p86_p4 }
   0xf   :  { %p89_p7 = pnand %p88_p6, %p82_p3 }
  0x11   :  { %92 = shalt.err (!%p89_p7)
}
  0x12   :  { %23 = dma.hbm_to_vmem [thread:$0]  %s206_s1, 256, %s21_s13, [#allocation4]  }
  0x13   :  { %s93_s28 = scalar_lea.hbm %s207_s2, 256 }
  0x14   :  { %p94_p8 = scmp.ne.s32.totalorder %s207_s2, %s93_s28  ;;  %p97_p9 = scmp.lt.u32.totalorder %s93_s28, %s207_s2 }
  0x16   :  { %p99_p10 = pnand %p97_p9, %p94_p8 }
  0x18   :  { %102 = shalt.err (!%p99_p10)
}
  0x19   :  { %s103_s6 = scalar_lea.vmem %s31_s15, 256  ;;  %p108_p12 = scmp.lt.s32.totalorder %s31_s15, %s31_s15 }
  0x1a   :  { %p104_p11 = scmp.ne.s32.totalorder %s31_s15, %s103_s6  ;;  %p109_p13 = scmp.lt.s32.totalorder %s103_s6, %s103_s6 }
  0x1c   :  { %p110_p0 = por %p109_p13, %p108_p12 }
  0x1e   :  { %p111_p1 = pnand %p110_p0, %p104_p11 }
  0x20   :  { %114 = shalt.err (!%p111_p1)
}
  0x21   :  { %33 = dma.hbm_to_vmem [thread:$0]  %s207_s2, 256, %s31_s15, [#allocation7]  }
  0x22   :  { %137 = dma.done.wait [#allocation4], 256  }
  0x23   :  { %138 = vsyncadd [#allocation4], 4294967040 }
  0x24   :  { %139 = dma.done.wait [#allocation7], 256  }
  0x25   :  { %140 = vsyncadd [#allocation7], 4294967040  ;;  %v41_v0 = vld [vmem:[#allocation3] sm:$0xff]  ;;  %v43_v1 = vld [vmem:[#allocation6] sm:$0xff]  ;;  %v47_v2 = vstv %s205_s0  ;;  %s145_s10 = smov [#allocation8]  }
  0x26   :  { %v42_v3 = vld [vmem:[#allocation3 + $0x8] sm:$0xff]  ;;  %v45_v4 = vsub.f32 %v41_v0, %v43_v1  ;;  %v44_v5 = vld [vmem:[#allocation6 + $0x8] sm:$0xff]  ;;  %s58_s11 = sshll.u32 %s145_s10, 4  ;;  %s59_s11 = int_to_ptr.vmem [resolvable:$true] %s58_s11 }
  0x27   :  { %v46_v6 = vsub.f32 %v42_v3, %v44_v5  ;;  %s115_s2 = scalar_lea.vmem %s59_s11, 256  ;;  %p120_p3 = scmp.lt.s32.totalorder %s59_s11, %s59_s11 }
  0x28   :  { %v48_v7 = vmul.f32 %v47_v2, %v45_v4  ;;  %p116_p2 = scmp.ne.s32.totalorder %s59_s11, %s115_s2  ;;  %p121_p4 = scmp.lt.s32.totalorder %s115_s2, %s115_s2 }
  0x29   :  { %v49_v8 = vmul.f32 %v47_v2, %v46_v6 }
  0x2a   :  { %50 = vst [vmem:[#allocation8] sm:$0xff] %v48_v7  ;;  %p122_p5 = por %p121_p4, %p120_p3 }
  0x2b   :  { %51 = vst [vmem:[#allocation8 + $0x8] sm:$0xff] %v49_v8 }
  0x2c   :  { %p123_p6 = pnand %p122_p5, %p116_p2 }
  0x2e   :  { %126 = shalt.err (!%p123_p6)
}
  0x2f   :  { %s127_s13 = scalar_lea.hbm %s208_s3, 256 }
  0x30   :  { %p128_p7 = scmp.ne.s32.totalorder %s208_s3, %s127_s13  ;;  %p131_p8 = scmp.lt.u32.totalorder %s127_s13, %s208_s3 }
  0x32   :  { %p133_p9 = pnand %p131_p8, %p128_p7 }
  0x34   :  { %136 = shalt.err (!%p133_p9)
}
  0x35   :  { %61 = dma.vmem_to_hbm [thread:$0]  %s59_s11, 256, %s208_s3, [#allocation5]  }
  0x36   :  { %141 = dma.done.wait [#allocation5], 256  }
  0x37   :  { %142 = vsyncadd [#allocation5], 4294967040 }
  0x38   :  { %65 = vsyncpa [#allocation4], 1 }
  0x39   :  { %66 = vsyncpa [#allocation7], 1 }
  0x3a   :  { %67 = vsyncpa [#allocation5], 1 }

</bundles_post_ra>
